<compile_context>
chip_gen: v6e
topology: v6e:2x2x1
jax: 0.10.0
libtpu: 0.0.40
codegen_flags: <defaults>
</compile_context>

<pallas_src>
import jax
import jax.numpy as jnp
from jax.experimental import pallas as pl
from jax.experimental.pallas import tpu as pltpu


def se_gate_conv_kernel(s_ref, x_ref, w1_ref, b1_ref, w2_ref, o_ref):
    # s_ref:  [1, 26]        squeeze input (spatially 1x1 already), f32
    # x_ref:  [208, 196]     main activations, channels-major (native NCHW, N=1), f32
    # w1_ref: [208, 26]      conv2d27 1x1 weight, native (out, in) orientation, f32
    # b1_ref: [208, 1]       conv2d27 bias as a column, f32
    # w2_ref: [Cb, 208]      conv2d28 1x1 weight block (bf16 on 1-step grid, f32 on v7x split)
    # o_ref:  [Cb, 196]      output block, f32
    s = jnp.maximum(s_ref[...], 0.0)                                     # relu  [1, 26], f32
    # 26->208 matmul with M=1: VPU mul + reduce (keeps the MXU free for the big matmul).
    g = jnp.sum(w1_ref[...] * s, axis=-1, keepdims=True) + b1_ref[...]   # [208, 1], f32
    gate = jax.nn.sigmoid(g)                                             # EUP, f32
    # Gate the activations in f32, then cast the MXU operand to bf16.
    gated = (gate * x_ref[...]).astype(jnp.bfloat16)                     # [208, 196]
    w2 = w2_ref[...].astype(jnp.bfloat16)                                # no-op if already bf16
    # 1x1 conv (208 -> 208), no bias: W2_block @ gated — bf16 x bf16 -> f32 accumulate.
    o_ref[...] = jnp.dot(w2, gated, preferred_element_type=jnp.float32)


def _num_output_blocks():
    """2 on v7x (shard the output rows across both TensorCores), else 1."""
    try:
        kind = jax.devices()[0].device_kind.lower()
    except Exception:
        return 1
    if "v7" in kind or "7x" in kind:
        return 2
    return 1


def forward_pallas(x81, x79, w1, b1, w2):
    """x81: [1, 26, 1, 1], x79: [1, 208, 14, 14] (NCHW, float32).
    w1: [208, 26] (conv2d27 1x1 weight), b1: [208], w2: [208, 208] (conv2d28 1x1, no bias)."""
    N, C, H, W = x79.shape
    assert N == 1
    HW = H * W
    C_se = x81.shape[1]

    # pure contiguous reshapes — no transposes, no extra XLA HBM round trips
    x = x79.reshape(C, HW)        # [208, 196]
    s = x81.reshape(1, C_se)      # [1, 26]
    b1c = b1.reshape(C, 1)        # [208, 1]

    n_blocks = _num_output_blocks()
    assert C % n_blocks == 0
    Cb = C // n_blocks

    if n_blocks == 1:
        # Single TC: pre-cast w2 to bf16 in HBM — halves the largest input load.
        w2_in = w2.astype(jnp.bfloat16)
    else:
        # v7x 2-way split: 104-row bf16 blocks would violate the 16-sublane packing rule,
        # so keep w2 f32 in HBM and cast to bf16 in-kernel.
        w2_in = w2

    flops = 2 * C * C * HW + 2 * C * C_se + C * HW
    bytes_accessed = (
        x.size * 4 + s.size * 4 + w1.size * 4 + b1c.size * 4
        + w2_in.size * w2_in.dtype.itemsize
        + C * HW * 4
    )

    full = lambda shape: pl.BlockSpec(shape, lambda i: (0, 0))

    out = pl.pallas_call(
        se_gate_conv_kernel,
        out_shape=jax.ShapeDtypeStruct((C, HW), jnp.float32),
        grid=(n_blocks,),
        in_specs=[
            full((1, C_se)),                              # s   (resident across steps)
            full((C, HW)),                                # x   (resident across steps)
            full((C, C_se)),                              # w1  (resident, native orientation)
            full((C, 1)),                                 # b1  (resident)
            pl.BlockSpec((Cb, C), lambda i: (i, 0)),      # w2  row-blocks
        ],
        out_specs=pl.BlockSpec((Cb, HW), lambda i: (i, 0)),
        compiler_params=pltpu.CompilerParams(
            dimension_semantics=("parallel",)),
        cost_estimate=pl.CostEstimate(
            flops=flops, transcendentals=C, bytes_accessed=bytes_accessed),
    )(s, x, w1, b1c, w2_in)

    # contiguous reshape back to NCHW — no transpose
    return out.reshape(N, C, H, W)


def forward_ref(x81, x79, w1, b1, w2):
    """Pure-JAX f32 reference of the PyTorch forward (NCHW semantics)."""
    s = jnp.maximum(x81, 0.0)[:, :, 0, 0]                     # [1, 26]
    g = s @ w1.T + b1                                         # [1, 208]
    gate = jax.nn.sigmoid(g)[:, :, None, None]                # [1, 208, 1, 1]
    gated = gate * x79                                        # [1, 208, 14, 14]
    # 1x1 conv, no bias: out[n, co, h, w] = sum_ci w2[co, ci] * gated[n, ci, h, w]
    return jnp.einsum("oc,nchw->nohw", w2, gated)


if __name__ == "__main__":
    key = jax.random.PRNGKey(0)
    k1, k2, k3, k4, k5 = jax.random.split(key, 5)

    C_se, C, H, W = 26, 208, 14, 14

    # deterministic synthetic parameters (shapes from the module's __init__)
    w1 = jax.random.normal(k1, (C, C_se), dtype=jnp.float32) * 0.1   # conv2d27 weight (1x1)
    b1 = jax.random.normal(k2, (C,), dtype=jnp.float32) * 0.1        # conv2d27 bias
    w2 = jax.random.normal(k3, (C, C), dtype=jnp.float32) * 0.05     # conv2d28 weight (1x1, no bias)

    # inputs implied by the module's forward
    x81 = jax.random.normal(k4, (1, C_se, 1, 1), dtype=jnp.float32)
    x79 = jax.random.normal(k5, (1, C, H, W), dtype=jnp.float32)

    out = forward_pallas(x81, x79, w1, b1, w2)
    out = jax.block_until_ready(out)

    ref = jax.block_until_ready(forward_ref(x81, x79, w1, b1, w2))
    assert out.shape == (1, C, H, W), out.shape
    # Tolerance relaxed vs. the pure-f32 version: the 208x208x196 matmul runs with
    # bf16 MXU operands (f32 accumulate).
    max_err = float(jnp.max(jnp.abs(out - ref)))
    assert jnp.allclose(out, ref, atol=3e-2, rtol=3e-2), max_err

    print("KERNEL_OK")
</pallas_src>

<mosaic_0001>
module attributes {stable_mosaic.version = 11 : i64} {
  func.func @se_gate_conv_kernel(%arg0: i32, %arg1: memref<1x26xf32, #tpu.memory_space<vmem>>, %arg2: memref<208x196xf32, #tpu.memory_space<vmem>>, %arg3: memref<208x26xf32, #tpu.memory_space<vmem>>, %arg4: memref<208x1xf32, #tpu.memory_space<vmem>>, %arg5: memref<208x208xbf16, #tpu.memory_space<vmem>>, %arg6: memref<208x196xf32, #tpu.memory_space<vmem>>) attributes {dimension_semantics = [#tpu.dimension_semantics<parallel>], iteration_bounds = array<i64: 1>, scalar_prefetch = 0 : i64, scratch_operands = 0 : i64, tpu.core_type = #tpu.core_type<tc>, window_params = [{pipeline_mode = #tpu.pipeline_mode<synchronous>, transform_indices = @transform_0, window_bounds = array<i64: 1, 26>}, {pipeline_mode = #tpu.pipeline_mode<synchronous>, transform_indices = @transform_1, window_bounds = array<i64: 208, 196>}, {pipeline_mode = #tpu.pipeline_mode<synchronous>, transform_indices = @transform_2, window_bounds = array<i64: 208, 26>}, {pipeline_mode = #tpu.pipeline_mode<synchronous>, transform_indices = @transform_3, window_bounds = array<i64: 208, 1>}, {transform_indices = @transform_4, window_bounds = array<i64: 208, 208>}, {transform_indices = @transform_5, window_bounds = array<i64: 208, 196>}]} {
    %c0 = arith.constant 0 : index
    %c0_0 = arith.constant 0 : index
    %0 = vector.load %arg1[%c0, %c0_0] : memref<1x26xf32, #tpu.memory_space<vmem>>, vector<1x26xf32>
    %cst = arith.constant 0.000000e+00 : f32
    %1 = vector.broadcast %cst : f32 to vector<1x26xf32>
    %2 = arith.maximumf %0, %1 : vector<1x26xf32>
    %c0_1 = arith.constant 0 : index
    %c0_2 = arith.constant 0 : index
    %3 = vector.load %arg3[%c0_1, %c0_2] : memref<208x26xf32, #tpu.memory_space<vmem>>, vector<208x26xf32>
    %4 = vector.broadcast %2 : vector<1x26xf32> to vector<208x26xf32>
    %5 = arith.mulf %3, %4 : vector<208x26xf32>
    %cst_3 = arith.constant dense<0.000000e+00> : vector<208xf32>
    %6 = vector.multi_reduction <add>, %5, %cst_3 [1] : vector<208x26xf32> to vector<208xf32>
    %7 = vector.shape_cast %6 : vector<208xf32> to vector<208x1xf32>
    %c0_4 = arith.constant 0 : index
    %c0_5 = arith.constant 0 : index
    %8 = vector.load %arg4[%c0_4, %c0_5] : memref<208x1xf32, #tpu.memory_space<vmem>>, vector<208x1xf32>
    %9 = arith.addf %7, %8 : vector<208x1xf32>
    %10 = arith.negf %9 : vector<208x1xf32>
    %11 = math.exp %10 : vector<208x1xf32>
    %cst_6 = arith.constant 1.000000e+00 : f32
    %12 = vector.broadcast %cst_6 : f32 to vector<208x1xf32>
    %13 = arith.addf %12, %11 : vector<208x1xf32>
    %14 = arith.divf %12, %13 : vector<208x1xf32>
    %c0_7 = arith.constant 0 : index
    %c0_8 = arith.constant 0 : index
    %15 = vector.load %arg2[%c0_7, %c0_8] : memref<208x196xf32, #tpu.memory_space<vmem>>, vector<208x196xf32>
    %16 = vector.broadcast %14 : vector<208x1xf32> to vector<208x196xf32>
    %17 = arith.mulf %16, %15 : vector<208x196xf32>
    %18 = arith.truncf %17 : vector<208x196xf32> to vector<208x196xbf16>
    %c0_9 = arith.constant 0 : index
    %c0_10 = arith.constant 0 : index
    %19 = vector.load %arg5[%c0_9, %c0_10] : memref<208x208xbf16, #tpu.memory_space<vmem>>, vector<208x208xbf16>
    %cst_11 = arith.constant dense<0.000000e+00> : vector<208x196xf32>
    %20 = tpu.matmul %19, %18, %cst_11 {dimension_numbers = #tpu.dot_dimension_numbers<[1], [0], [0], [1], [0, 0, 1, 1], [], []>} : vector<208x208xbf16>, vector<208x196xbf16>, vector<208x196xf32> -> vector<208x196xf32>
    %c0_12 = arith.constant 0 : index
    %c0_13 = arith.constant 0 : index
    %21 = vector.load %arg6[%c0_12, %c0_13] : memref<208x196xf32, #tpu.memory_space<vmem>>, vector<208x196xf32>
    tpu.vector_store %arg6[%c0_12, %c0_13], %20 {strides = array<i32>} : memref<208x196xf32, #tpu.memory_space<vmem>>, vector<208x196xf32>,
    return
  }
  func.func @transform_0(%arg0: i32) -> (i32, i32) {
    %c0_i32 = arith.constant 0 : i32
    %c0_i32_0 = arith.constant 0 : i32
    %c0_i32_1 = arith.constant 0 : i32
    return %c0_i32, %c0_i32_0 : i32, i32
  }
  func.func @transform_1(%arg0: i32) -> (i32, i32) {
    %c0_i32 = arith.constant 0 : i32
    %c0_i32_0 = arith.constant 0 : i32
    %c0_i32_1 = arith.constant 0 : i32
    return %c0_i32, %c0_i32_0 : i32, i32
  }
  func.func @transform_2(%arg0: i32) -> (i32, i32) {
    %c0_i32 = arith.constant 0 : i32
    %c0_i32_0 = arith.constant 0 : i32
    %c0_i32_1 = arith.constant 0 : i32
    return %c0_i32, %c0_i32_0 : i32, i32
  }
  func.func @transform_3(%arg0: i32) -> (i32, i32) {
    %c0_i32 = arith.constant 0 : i32
    %c0_i32_0 = arith.constant 0 : i32
    %c0_i32_1 = arith.constant 0 : i32
    return %c0_i32, %c0_i32_0 : i32, i32
  }
  func.func @transform_4(%arg0: i32) -> (i32, i32) {
    %c0_i32 = arith.constant 0 : i32
    %c0_i32_0 = arith.constant 0 : i32
    return %arg0, %c0_i32 : i32, i32
  }
  func.func @transform_5(%arg0: i32) -> (i32, i32) {
    %c0_i32 = arith.constant 0 : i32
    %c0_i32_0 = arith.constant 0 : i32
    return %arg0, %c0_i32 : i32, i32
  }
}

</mosaic_0001>

<bundles_post_ra>
// kernel: tpu_custom_call.1
= control target key start
LH: loop header
LB: loop body
LE: loop exit
PB: predicated region body
PF: predicated region fallthrough
CT: control target
= control target key end

     0   :  { %v50_v0 = vlaneseq  ;;  %vm81_vm0 = vcmask 211968   ;;  %vm771_vm1 = vcmask 654336   ;;  %vm975_vm2 = vcmask 556032   ;;  %s1941_s0 = inlined_call_operand.vmem [shape: f32[1,26], index: 0, kind: input, shape index: {}]   ;;  %s1942_s2 = inlined_call_operand.vmem [shape: f32[208,26], index: 2, kind: input, shape index: {}]   ;;  %s1943_s3 = inlined_call_operand.vmem [shape: f32[208,1], index: 3, kind: input, shape index: {}]   ;;  %s1944_s4 = inlined_call_operand.vmem [shape: bf16[208,208], index: 4, kind: input, shape index: {}]   ;;  %s1945_s1 = inlined_call_operand.vmem [shape: f32[208,196], index: 1, kind: input, shape index: {}]   ;;  %s1946_s5 = inlined_call_operand.vmem [shape: f32[208,196], index: 5, kind: output, shape index: {}]  }
   0x1   :  { %v21_v1 = vld [vmem:[%s1941_s0] sm:$0x1]  ;;  %v37_v4 = vld [vmem:[%s1942_s2 + $0x70] sm:$0xff]  ;;  %v38_v7 = vld [vmem:[%s1942_s2 + $0x78] sm:$0xff] }
   0x2   :  { %v22_v2 = vmax.f32 %v21_v1, 0.0  ;;  %v51_v3 = vshrl.u32 %v50_v0, 7  ;;  %v35_v6 = vld [vmem:[%s1942_s2 + $0x60] sm:$0xff]  ;;  %v36_v8 = vld [vmem:[%s1942_s2 + $0x68] sm:$0xff]  ;;  %v34_v14 = vld [vmem:[%s1942_s2 + $0x58] sm:$0xff] }
   0x3   :  { %v33_v15 = vld [vmem:[%s1942_s2 + $0x50] sm:$0xff]  ;;  %v32_v22 = vld [vmem:[%s1942_s2 + $0x48] sm:$0xff]  ;;  %v31_v23 = vld [vmem:[%s1942_s2 + $0x40] sm:$0xff] }
   0x4   :  { %v52_v5 = vsub.s32 0, %v51_v3  ;;  %v30_v28 = vld [vmem:[%s1942_s2 + $0x38] sm:$0xff]  ;;  %v29_v29 = vld [vmem:[%s1942_s2 + $0x30] sm:$0xff]  ;;  %v28_v34 = vld [vmem:[%s1942_s2 + $0x28] sm:$0xff] }
   0x5   :  { %v27_v35 = vld [vmem:[%s1942_s2 + $0x20] sm:$0xff]  ;;  %v26_v40 = vld [vmem:[%s1942_s2 + $0x18] sm:$0xff]  ;;  %v25_v41 = vld [vmem:[%s1942_s2 + $0x10] sm:$0xff] }
   0x6   :  { %v1314_v9 = vrot.slane %v22_v2, %v52_v5  ;;  %v24_v46 = vld [vmem:[%s1942_s2 + $0x8] sm:$0xff]  ;;  %v23_v47 = vld [vmem:[%s1942_s2] sm:$0xff]  ;;  %v46_v58 = vld [vmem:[%s1942_s2 + $0xb8] sm:$0xff] }
   0x7   :  { %v48_v52 = vld [vmem:[%s1942_s2 + $0xc8] sm:$0xff]  ;;  %v47_v53 = vld [vmem:[%s1942_s2 + $0xc0] sm:$0xff]  ;;  %v45_v59 = vld [vmem:[%s1942_s2 + $0xb0] sm:$0xff] }
   0x8   :  { %v69_v10 = vmul.f32 %v1314_v9, %v37_v4  ;;  %v67_v11 = vmul.f32 %v1314_v9, %v35_v6  ;;  %v70_v12 = vmul.f32 %v1314_v9, %v38_v7  ;;  %v68_v13 = vmul.f32 %v1314_v9, %v36_v8  ;;  %v44_v0 = vld [vmem:[%s1942_s2 + $0xa8] sm:$0xff]  ;;  %v43_v1 = vld [vmem:[%s1942_s2 + $0xa0] sm:$0xff]  ;;  %v42_v6 = vld [vmem:[%s1942_s2 + $0x98] sm:$0xff] }
   0x9   :  { %v66_v20 = vmul.f32 %v1314_v9, %v34_v14  ;;  %v65_v21 = vmul.f32 %v1314_v9, %v33_v15  ;;  %v64_v25 = vmul.f32 %v1314_v9, %v32_v22  ;;  %v63_v27 = vmul.f32 %v1314_v9, %v31_v23  ;;  %v41_v7 = vld [vmem:[%s1942_s2 + $0x90] sm:$0xff]  ;;  %v39_v14 = vld [vmem:[%s1942_s2 + $0x80] sm:$0xff] }
   0xa   :  { %v124_v16 = vsel %vm81_vm0, %v69_v10, 0.0  ;;  %v118_v17 = vsel %vm81_vm0, %v67_v11, 0.0  ;;  %v127_v18 = vsel %vm81_vm0, %v70_v12, 0.0  ;;  %v121_v19 = vsel %vm81_vm0, %v68_v13, 0.0  ;;  %v40_v13 = vld [vmem:[%s1942_s2 + $0x88] sm:$0xff]  ;;  %v174_v22 = vld [vmem:[%s1943_s3 + $0x70] sm:$0xff] }
   0xb   :  { %125 = vadd.xlane.f32.xlu0 %v124_v16  ;;  %119 = vadd.xlane.f32.xlu1 %v118_v17  ;;  %v115_v24 = vsel %vm81_vm0, %v66_v20, 0.0  ;;  %v112_v26 = vsel %vm81_vm0, %v65_v21, 0.0  ;;  %v109_v30 = vsel %vm81_vm0, %v64_v25, 0.0  ;;  %v62_v31 = vmul.f32 %v1314_v9, %v30_v28  ;;  %v172_v23 = vld [vmem:[%s1943_s3 + $0x60] sm:$0xff]  ;;  %v173_v28 = vld [vmem:[%s1943_s3 + $0x68] sm:$0xff] }
   0xc   :  { %v106_v32 = vsel %vm81_vm0, %v63_v27, 0.0  ;;  %v61_v33 = vmul.f32 %v1314_v9, %v29_v29  ;;  %v60_v37 = vmul.f32 %v1314_v9, %v28_v34  ;;  %v59_v39 = vmul.f32 %v1314_v9, %v27_v35  ;;  %v175_v27 = vld [vmem:[%s1943_s3 + $0x78] sm:$0xff] }
   0xd   :  { %v103_v36 = vsel %vm81_vm0, %v62_v31, 0.0  ;;  %v58_v43 = vmul.f32 %v1314_v9, %v26_v40  ;;  %v57_v45 = vmul.f32 %v1314_v9, %v25_v41  ;;  %v56_v49 = vmul.f32 %v1314_v9, %v24_v46  ;;  %v171_v35 = vld [vmem:[%s1943_s3 + $0x58] sm:$0xff] }
   0xe   :  { %v100_v38 = vsel %vm81_vm0, %v61_v33, 0.0  ;;  %v97_v42 = vsel %vm81_vm0, %v60_v37, 0.0  ;;  %v94_v44 = vsel %vm81_vm0, %v59_v39, 0.0  ;;  %v55_v51 = vmul.f32 %v1314_v9, %v23_v47 }
   0xf   :  { %128 = vadd.xlane.f32.xlu0 %v127_v18  ;;  %122 = vadd.xlane.f32.xlu1 %v121_v19  ;;  %v91_v48 = vsel %vm81_vm0, %v58_v43, 0.0  ;;  %v88_v50 = vsel %vm81_vm0, %v57_v45, 0.0  ;;  %v85_v54 = vsel %vm81_vm0, %v56_v49, 0.0  ;;  %v80_v55 = vmul.f32 %v1314_v9, %v48_v52  ;;  %v168_v43 = vld [vmem:[%s1943_s3 + $0x40] sm:$0xff] }
  0x10   :  { %v82_v56 = vsel %vm81_vm0, %v55_v51, 0.0  ;;  %v79_v57 = vmul.f32 %v1314_v9, %v47_v53  ;;  %v78_v61 = vmul.f32 %v1314_v9, %v46_v58  ;;  %v77_v63 = vmul.f32 %v1314_v9, %v45_v59  ;;  %v165_v58 = vld [vmem:[%s1943_s3 + $0x28] sm:$0xff] }
  0x11   :  { %v157_v60 = vsel %vm81_vm0, %v80_v55, 0.0  ;;  %v76_v3 = vmul.f32 %v1314_v9, %v44_v0  ;;  %v75_v5 = vmul.f32 %v1314_v9, %v43_v1  ;;  %v74_v10 = vmul.f32 %v1314_v9, %v42_v6  ;;  %v163_v6 = vld [vmem:[%s1943_s3 + $0x18] sm:$0xff] }
  0x12   :  { %v154_v62 = vsel %vm81_vm0, %v79_v57, 0.0  ;;  %v151_v2 = vsel %vm81_vm0, %v78_v61, 0.0  ;;  %v148_v4 = vsel %vm81_vm0, %v77_v63, 0.0  ;;  %v73_v12 = vmul.f32 %v1314_v9, %v41_v7 }
  0x13   :  { %116 = vadd.xlane.f32.xlu1 %v115_v24  ;;  %113 = vadd.xlane.f32.xlu0 %v112_v26  ;;  %v145_v8 = vsel %vm81_vm0, %v76_v3, 0.0  ;;  %v142_v11 = vsel %vm81_vm0, %v75_v5, 0.0  ;;  %v139_v15 = vsel %vm81_vm0, %v74_v10, 0.0  ;;  %v72_v16 = vmul.f32 %v1314_v9, %v40_v13  ;;  %v164_v3 = vld [vmem:[%s1943_s3 + $0x20] sm:$0xff] }
  0x14   :  { %v136_v17 = vsel %vm81_vm0, %v73_v12, 0.0  ;;  %v71_v18 = vmul.f32 %v1314_v9, %v39_v14  ;;  %v1268_v21 = vmov 0  }
  0x15   :  { %v133_v19 = vsel %vm81_vm0, %v72_v16, 0.0  ;;  %1123 = vset.pattern.permute.xlu0 %v1268_v21  ;;  %1124 = vset.pattern.permute.xlu1 %v1268_v21 }
  0x16   :  { %v130_v20 = vsel %vm81_vm0, %v71_v18, 0.0 }
  0x17   :  { %110 = vadd.xlane.f32.xlu1 %v109_v30  ;;  %107 = vadd.xlane.f32.xlu0 %v106_v32 }
  0x1b   :  { %104 = vadd.xlane.f32.xlu1 %v103_v36  ;;  %101 = vadd.xlane.f32.xlu0 %v100_v38  ;;  %v170_v36 = vld [vmem:[%s1943_s3 + $0x50] sm:$0xff] }
  0x1f   :  { %98 = vadd.xlane.f32.xlu1 %v97_v42  ;;  %95 = vadd.xlane.f32.xlu0 %v94_v44 }
  0x23   :  { %92 = vadd.xlane.f32.xlu1 %v91_v48  ;;  %89 = vadd.xlane.f32.xlu0 %v88_v50  ;;  %v169_v48 = vld [vmem:[%s1943_s3 + $0x48] sm:$0xff]  ;;  %v167_v50 = vld [vmem:[%s1943_s3 + $0x38] sm:$0xff] }
  0x27   :  { %86 = vadd.xlane.f32.xlu1 %v85_v54  ;;  %83 = vadd.xlane.f32.xlu0 %v82_v56  ;;  %v166_v56 = vld [vmem:[%s1943_s3 + $0x30] sm:$0xff] }
  0x2b   :  { %158 = vadd.xlane.f32.xlu1 %v157_v60  ;;  %155 = vadd.xlane.f32.xlu0 %v154_v62 }
  0x2f   :  { %152 = vadd.xlane.f32.xlu1 %v151_v2  ;;  %149 = vadd.xlane.f32.xlu0 %v148_v4 }
  0x33   :  { %146 = vadd.xlane.f32.xlu1 %v145_v8  ;;  %143 = vadd.xlane.f32.xlu0 %v142_v11 }
  0x37   :  { %140 = vadd.xlane.f32.xlu1 %v139_v15  ;;  %137 = vadd.xlane.f32.xlu0 %v136_v17  ;;  %v161_v17 = vld [vmem:[%s1943_s3 + $0x8] sm:$0xff] }
  0x3b   :  { %134 = vadd.xlane.f32.xlu1 %v133_v19  ;;  %131 = vadd.xlane.f32.xlu0 %v130_v20  ;;  %v162_v20 = vld [vmem:[%s1943_s3 + $0x10] sm:$0xff] }
  0x94   :  { %v126_v9 = vpop.xlane.xlu0 %125  ;;  %v120_v24 = vpop.xlane.xlu1 %119 }
  0x95   :  { %v200_v25 = vadd.f32 %v174_v22, %v126_v9  ;;  %v198_v26 = vadd.f32 %v172_v23, %v120_v24 }
  0x97   :  { %v1045_v29 = vmul.f32 -1.442695, %v200_v25  ;;  %v1043_v30 = vmul.f32 -1.442695, %v198_v26  ;;  %v185_v26 = vld [vmem:[%s1943_s3 + $0xc8] sm:$0xff] }
  0x98   :  { %v129_v31 = vpop.xlane.xlu0 %128  ;;  %v123_v32 = vpop.xlane.xlu1 %122 }
  0x99   :  { %1164 = vpow2.f32 %v1045_v29  ;;  %v201_v33 = vadd.f32 %v175_v27, %v129_v31  ;;  %v199_v34 = vadd.f32 %v173_v28, %v123_v32  ;;  %v160_v29 = vld [vmem:[%s1943_s3] sm:$0xff] }
  0x9a   :  { %1166 = vpow2.f32 %v1043_v30 }
  0x9b   :  { %v1046_v37 = vmul.f32 -1.442695, %v201_v33  ;;  %v1044_v38 = vmul.f32 -1.442695, %v199_v34 }
  0x9c   :  { %v117_v39 = vpop.xlane.xlu1 %116  ;;  %v114_v40 = vpop.xlane.xlu0 %113 }
  0x9d   :  { %1168 = vpow2.f32 %v1046_v37  ;;  %v197_v41 = vadd.f32 %v171_v35, %v117_v39  ;;  %v196_v42 = vadd.f32 %v170_v36, %v114_v40  ;;  %v183_v36 = vld [vmem:[%s1943_s3 + $0xb8] sm:$0xff]  ;;  %v184_v40 = vld [vmem:[%s1943_s3 + $0xc0] sm:$0xff] }
  0x9e   :  { %1170 = vpow2.f32 %v1044_v38 }
  0x9f   :  { %v1041_v44 = vmul.f32 -1.442695, %v196_v42  ;;  %v1042_v45 = vmul.f32 -1.442695, %v197_v41 }
  0xa0   :  { %v111_v46 = vpop.xlane.xlu1 %110  ;;  %v108_v47 = vpop.xlane.xlu0 %107 }
  0xa1   :  { %v194_v49 = vadd.f32 %v168_v43, %v108_v47  ;;  %1172 = vpow2.f32 %v1041_v44  ;;  %v195_v51 = vadd.f32 %v169_v48, %v111_v46 }
  0xa2   :  { %1174 = vpow2.f32 %v1042_v45 }
  0xa3   :  { %v1039_v53 = vmul.f32 -1.442695, %v194_v49  ;;  %v1040_v62 = vmul.f32 -1.442695, %v195_v51  ;;  %v181_v49 = vld [vmem:[%s1943_s3 + $0xa8] sm:$0xff] }
  0xa4   :  { %v105_v52 = vpop.xlane.xlu1 %104  ;;  %v102_v54 = vpop.xlane.xlu0 %101 }
  0xa5   :  { %v193_v55 = vadd.f32 %v167_v50, %v105_v52  ;;  %1176 = vpow2.f32 %v1039_v53  ;;  %v192_v0 = vadd.f32 %v166_v56, %v102_v54  ;;  %v182_v54 = vld [vmem:[%s1943_s3 + $0xb0] sm:$0xff] }
  0xa6   :  { %v1165_v57 = vpop.eup %1164 }
  0xa7   :  { %v1167_v59 = vpop.eup %1166  ;;  %v304_v60 = vadd.f32 1.0, %v1165_v57  ;;  %v1038_v61 = vmul.f32 -1.442695, %v193_v55  ;;  %v1037_v12 = vmul.f32 -1.442695, %v192_v0 }
  0xa8   :  { %v99_v63 = vpop.xlane.xlu1 %98  ;;  %v96_v1 = vpop.xlane.xlu0 %95  ;;  %v302_v5 = vadd.f32 1.0, %v1167_v59 }
  0xa9   :  { %1178 = vrcp.f32 %v304_v60  ;;  %v191_v2 = vadd.f32 %v165_v58, %v99_v63  ;;  %v190_v13 = vadd.f32 %v164_v3, %v96_v1  ;;  %v180_v3 = vld [vmem:[%s1943_s3 + $0xa0] sm:$0xff] }
  0xaa   :  { %v1169_v4 = vpop.eup %1168  ;;  %1180 = vpow2.f32 %v1038_v61 }
  0xab   :  { %v1171_v7 = vpop.eup %1170  ;;  %v305_v8 = vadd.f32 1.0, %v1169_v4  ;;  %v1036_v10 = vmul.f32 -1.442695, %v191_v2  ;;  %1182 = vpow2.f32 %v1040_v62  ;;  %v1035_v22 = vmul.f32 -1.442695, %v190_v13  ;;  %v179_v62 = vld [vmem:[%s1943_s3 + $0x98] sm:$0xff] }
  0xac   :  { %v93_v11 = vpop.xlane.xlu1 %92  ;;  %v90_v14 = vpop.xlane.xlu0 %89  ;;  %v303_v16 = vadd.f32 1.0, %v1171_v7 }
  0xad   :  { %1184 = vrcp.f32 %v305_v8  ;;  %v189_v15 = vadd.f32 %v163_v6, %v93_v11  ;;  %v188_v27 = vadd.f32 %v162_v20, %v90_v14  ;;  %v177_v11 = vld [vmem:[%s1943_s3 + $0x88] sm:$0xff]  ;;  %v178_v20 = vld [vmem:[%s1943_s3 + $0x90] sm:$0xff] }
  0xae   :  { %1186 = vrcp.f32 %v302_v5  ;;  %v1173_v18 = vpop.eup %1172 }
  0xaf   :  { %1188 = vpow2.f32 %v1036_v10  ;;  %v1034_v19 = vmul.f32 -1.442695, %v189_v15  ;;  %v1175_v9 = vpop.eup %1174  ;;  %v300_v25 = vadd.f32 1.0, %v1173_v18  ;;  %v1033_v37 = vmul.f32 -1.442695, %v188_v27 }
  0xb0   :  { %v87_v21 = vpop.xlane.xlu1 %86  ;;  %1190 = vpow2.f32 %v1037_v12  ;;  %v84_v23 = vpop.xlane.xlu0 %83  ;;  %v301_v30 = vadd.f32 1.0, %v1175_v9 }
  0xb1   :  { %v187_v24 = vadd.f32 %v161_v17, %v87_v21  ;;  %1192 = vrcp.f32 %v303_v16  ;;  %v186_v38 = vadd.f32 %v160_v29, %v84_v23 }
  0xb2   :  { %1194 = vpow2.f32 %v1034_v19  ;;  %v1177_v33 = vpop.eup %1176 }
  0xb3   :  { %v1032_v28 = vmul.f32 -1.442695, %v187_v24  ;;  %1196 = vpow2.f32 %v1035_v22  ;;  %v298_v42 = vadd.f32 1.0, %v1177_v33  ;;  %v1031_v50 = vmul.f32 -1.442695, %v186_v38 }
  0xb4   :  { %v159_v31 = vpop.xlane.xlu1 %158  ;;  %v156_v32 = vpop.xlane.xlu0 %155  ;;  %1198 = vrcp.f32 %v300_v25 }
  0xb5   :  { %v211_v34 = vadd.f32 %v185_v26, %v159_v31  ;;  %1200 = vpow2.f32 %v1032_v28  ;;  %v210_v51 = vadd.f32 %v184_v40, %v156_v32 }
  0xb6   :  { %v1179_v35 = vpop.eup %1178  ;;  %1202 = vrcp.f32 %v301_v30  ;;  %v176_v30 = vld [vmem:[%s1943_s3 + $0x80] sm:$0xff] }
  0xb7   :  { %v1056_v39 = vmul.f32 -1.442695, %v211_v34  ;;  %492 = vperm.xlu0 %1123, %v1179_v35   ;;  %v1181_v41 = vpop.eup %1180  ;;  %v1055_v63 = vmul.f32 -1.442695, %v210_v51 }
  0xb8   :  { %v153_v43 = vpop.xlane.xlu1 %152  ;;  %v150_v44 = vpop.xlane.xlu0 %149  ;;  %v297_v46 = vadd.f32 1.0, %v1181_v41 }
  0xb9   :  { %v1183_v45 = vpop.eup %1182  ;;  %1204 = vpow2.f32 %v1056_v39  ;;  %v209_v47 = vadd.f32 %v183_v36, %v153_v43  ;;  %v208_v0 = vadd.f32 %v182_v54, %v150_v44 }
  0xba   :  { %v1185_v48 = vpop.eup %1184  ;;  %1206 = vpow2.f32 %v1033_v37  ;;  %v299_v56 = vadd.f32 1.0, %v1183_v45 }
  0xbb   :  { %v1187_v52 = vpop.eup %1186  ;;  %1208 = vrcp.f32 %v297_v46  ;;  %v1054_v53 = vmul.f32 -1.442695, %v209_v47  ;;  %497 = vperm.xlu1 %1124, %v1185_v48   ;;  %v1053_v12 = vmul.f32 -1.442695, %v208_v0 }
  0xbc   :  { %v1189_v55 = vpop.eup %1188  ;;  %1210 = vrcp.f32 %v298_v42  ;;  %v147_v57 = vpop.xlane.xlu1 %146 }
  0xbd   :  { %v144_v58 = vpop.xlane.xlu0 %143  ;;  %v1191_v59 = vpop.eup %1190  ;;  %v295_v60 = vadd.f32 1.0, %v1189_v55  ;;  %1212 = vpow2.f32 %v1054_v53  ;;  %v207_v61 = vadd.f32 %v181_v49, %v147_v57 }
  0xbe   :  { %1214 = vpow2.f32 %v1031_v50  ;;  %v1193_v1 = vpop.eup %1192  ;;  %v296_v5 = vadd.f32 1.0, %v1191_v59  ;;  %v206_v13 = vadd.f32 %v180_v3, %v144_v58 }
  0xbf   :  { %1216 = vrcp.f32 %v295_v60  ;;  %v1052_v2 = vmul.f32 -1.442695, %v207_v61  ;;  %482 = vperm.xlu1 %1124, %v1187_v52   ;;  %v1195_v4 = vpop.eup %1194 }
  0xc0   :  { %1218 = vrcp.f32 %v299_v56  ;;  %v141_v6 = vpop.xlane.xlu1 %140  ;;  %v1197_v7 = vpop.eup %1196  ;;  %v293_v8 = vadd.f32 1.0, %v1195_v4  ;;  %v1051_v24 = vmul.f32 -1.442695, %v206_v13  ;;  %v1130_v13 = vld [vmem:[%s1944_s4 + $0x74] ss:$8 sps:$4 sm:$0xff]  }
  0xc1   :  { %1220 = vpow2.f32 %v1052_v2  ;;  %v205_v10 = vadd.f32 %v179_v62, %v141_v6  ;;  %v138_v14 = vpop.xlane.xlu0 %137  ;;  %v1199_v15 = vpop.eup %1198  ;;  %v294_v18 = vadd.f32 1.0, %v1197_v7  ;;  %1090 = vmatprep.mubr.msk.bf16.mxu1 %vm771_vm1, %v1130_v13  ;;  %v376_v13 = vld [vmem:[%s1945_s1 + $0x40] sm:$0xff] }
  0xc2   :  { %1222 = vpow2.f32 %v1055_v63  ;;  %v1201_v17 = vpop.eup %1200  ;;  %v204_v28 = vadd.f32 %v178_v20, %v138_v14  ;;  %v396_v14 = vld [vmem:[%s1945_s1 + $0xe0] sm:$0xff] }
  0xc3   :  { %1224 = vrcp.f32 %v293_v8  ;;  %v1050_v16 = vmul.f32 -1.442695, %v205_v10  ;;  %487 = vperm.xlu1 %1124, %v1193_v1   ;;  %v1203_v21 = vpop.eup %1202  ;;  %v291_v22 = vadd.f32 1.0, %v1201_v17  ;;  %v398_v17 = vld [vmem:[%s1945_s1 + $0xf0] sm:$0xff] }
  0xc4   :  { %1226 = vrcp.f32 %v296_v5  ;;  %v135_v19 = vpop.xlane.xlu1 %134  ;;  %v1049_v37 = vmul.f32 -1.442695, %v204_v28  ;;  %v394_v28 = vld [vmem:[%s1945_s1 + $0xd0] sm:$0xff] }
  0xc5   :  { %1228 = vpow2.f32 %v1050_v16  ;;  %v203_v23 = vadd.f32 %v177_v11, %v135_v19  ;;  %v132_v31 = vpop.xlane.xlu0 %131 }
  0xc6   :  { %v1205_v9 = vpop.eup %1204  ;;  %1230 = vpow2.f32 %v1053_v12  ;;  %v202_v38 = vadd.f32 %v176_v30, %v132_v31  ;;  %v1127_v12 = vld [vmem:[%s1944_s4 + $0x4] ss:$8 sps:$4 sm:$0xff]  }
  0xc7   :  { %v1207_v25 = vpop.eup %1206  ;;  %1232 = vrcp.f32 %v291_v22  ;;  %v315_v26 = vadd.f32 1.0, %v1205_v9  ;;  %v1048_v27 = vmul.f32 -1.442695, %v203_v23  ;;  %472 = vperm.xlu1 %1124, %v1199_v15   ;;  %1083 = vmatprep.mubr.msk.bf16.mxu0 %vm771_vm1, %v1127_v12  ;;  %v397_v15 = vld [vmem:[%s1945_s1 + $0xe8] sm:$0xff]  ;;  %v379_v12 = vld [vmem:[%s1945_s1 + $0x58] sm:$0xff] }
  0xc8   :  { %v1209_v29 = vpop.eup %1208  ;;  %1234 = vrcp.f32 %v294_v18  ;;  %v292_v34 = vadd.f32 1.0, %v1207_v25  ;;  %v1047_v45 = vmul.f32 -1.442695, %v202_v38  ;;  %v399_v18 = vld [vmem:[%s1945_s1 + $0xf8] sm:$0xff]  ;;  %v388_v38 = vld [vmem:[%s1945_s1 + $0xa0] sm:$0xff] }
  0xc9   :  { %v1211_v32 = vpop.eup %1210  ;;  %1236 = vrcp.f32 %v315_v26  ;;  %457 = vperm.xlu0 %1123, %v1209_v29   ;;  %v392_v26 = vld [vmem:[%s1945_s1 + $0xc0] sm:$0xff]  ;;  %v395_v29 = vld [vmem:[%s1945_s1 + $0xd8] sm:$0xff] }
  0xca   :  { %v1213_v33 = vpop.eup %1212  ;;  %1238 = vpow2.f32 %v1048_v27  ;;  %v393_v27 = vld [vmem:[%s1945_s1 + $0xc8] sm:$0xff] }
  0xcb   :  { %v1215_v35 = vpop.eup %1214  ;;  %v313_v36 = vadd.f32 1.0, %v1213_v33  ;;  %477 = vperm.xlu1 %1124, %v1203_v21   ;;  %1240 = vpow2.f32 %v1051_v24 }
  0xcc   :  { %v1217_v39 = vpop.eup %1216  ;;  %v290_v42 = vadd.f32 1.0, %v1215_v35 }
  0xcd   :  { %v1219_v40 = vpop.eup %1218  ;;  %1242 = vrcp.f32 %v313_v36  ;;  %447 = vperm.xlu0 %1123, %v1217_v39   ;;  %v389_v39 = vld [vmem:[%s1945_s1 + $0xa8] sm:$0xff] }
  0xce   :  { %v1221_v41 = vpop.eup %1220  ;;  %1244 = vrcp.f32 %v292_v34 }
  0xcf   :  { %v1223_v43 = vpop.eup %1222  ;;  %v311_v44 = vadd.f32 1.0, %v1221_v41  ;;  %462 = vperm.xlu1 %1124, %v1211_v32   ;;  %1246 = vpow2.f32 %v1049_v37  ;;  %v390_v41 = vld [vmem:[%s1945_s1 + $0xb0] sm:$0xff] }
  0xd0   :  { %v1225_v46 = vpop.eup %1224  ;;  %v314_v51 = vadd.f32 1.0, %v1223_v43 }
  0xd1   :  { %v1227_v47 = vpop.eup %1226  ;;  %1248 = vrcp.f32 %v311_v44  ;;  %437 = vperm.xlu0 %1123, %v1225_v46  }
  0xd2   :  { %v1229_v48 = vpop.eup %1228  ;;  %1250 = vrcp.f32 %v290_v42  ;;  %v391_v42 = vld [vmem:[%s1945_s1 + $0xb8] sm:$0xff] }
  0xd3   :  { %v1231_v49 = vpop.eup %1230  ;;  %v309_v50 = vadd.f32 1.0, %v1229_v48  ;;  %467 = vperm.xlu1 %1124, %v1219_v40   ;;  %1252 = vpow2.f32 %v1047_v45 }
  0xd4   :  { %v1233_v52 = vpop.eup %1232  ;;  %v312_v56 = vadd.f32 1.0, %v1231_v49 }
  0xd5   :  { %v1235_v53 = vpop.eup %1234  ;;  %1254 = vrcp.f32 %v309_v50  ;;  %427 = vperm.xlu0 %1123, %v1233_v52   ;;  %v384_v52 = vld [vmem:[%s1945_s1 + $0x80] sm:$0xff] }
  0xd6   :  { %v1237_v54 = vpop.eup %1236  ;;  %1256 = vrcp.f32 %v314_v51 }
  0xd7   :  { %v1239_v55 = vpop.eup %1238  ;;  %452 = vperm.xlu1 %1124, %v1227_v47  }
  0xd8   :  { %v1241_v57 = vpop.eup %1240  ;;  %v307_v58 = vadd.f32 1.0, %v1239_v55  ;;  %v386_v55 = vld [vmem:[%s1945_s1 + $0x90] sm:$0xff] }
  0xd9   :  { %547 = vperm.xlu0 %1123, %v1237_v54   ;;  %v310_v61 = vadd.f32 1.0, %v1241_v57 }
  0xda   :  { %v1243_v59 = vpop.eup %1242  ;;  %1258 = vrcp.f32 %v307_v58  ;;  %v382_v58 = vld [vmem:[%s1945_s1 + $0x70] sm:$0xff] }
  0xdb   :  { %v1245_v60 = vpop.eup %1244  ;;  %1260 = vrcp.f32 %v312_v56  ;;  %442 = vperm.xlu1 %1124, %v1235_v53   ;;  %v385_v53 = vld [vmem:[%s1945_s1 + $0x88] sm:$0xff]  ;;  %v387_v56 = vld [vmem:[%s1945_s1 + $0x98] sm:$0xff] }
  0xdc   :  { %v1247_v62 = vpop.eup %1246  ;;  %1262 = vrcp.f32 %v310_v61 }
  0xdd   :  { %537 = vperm.xlu0 %1123, %v1243_v59   ;;  %v308_v1 = vadd.f32 1.0, %v1247_v62 }
  0xde   :  { %v1249_v63 = vpop.eup %1248 }
  0xdf   :  { %v1251_v0 = vpop.eup %1250  ;;  %432 = vperm.xlu1 %1124, %v1245_v60   ;;  %1264 = vrcp.f32 %v308_v1  ;;  %v381_v1 = vld [vmem:[%s1945_s1 + $0x68] sm:$0xff] }
  0xe0   :  { %v1253_v2 = vpop.eup %1252 }
  0xe1   :  { %527 = vperm.xlu0 %1123, %v1249_v63   ;;  %v306_v4 = vadd.f32 1.0, %v1253_v2  ;;  %v383_v63 = vld [vmem:[%s1945_s1 + $0x78] sm:$0xff] }
  0xe2   :  { %v1255_v3 = vpop.eup %1254 }
  0xe3   :  { %422 = vperm.xlu1 %1124, %v1251_v0   ;;  %v1257_v5 = vpop.eup %1256  ;;  %1266 = vrcp.f32 %v306_v4  ;;  %v380_v0 = vld [vmem:[%s1945_s1 + $0x60] sm:$0xff] }
  0xe5   :  { %517 = vperm.xlu0 %1123, %v1255_v3  }
  0xe7   :  { %v1259_v6 = vpop.eup %1258  ;;  %542 = vperm.xlu1 %1124, %v1257_v5  }
  0xe8   :  { %v1261_v7 = vpop.eup %1260 }
  0xe9   :  { %507 = vperm.xlu0 %1123, %v1259_v6   ;;  %v1263_v8 = vpop.eup %1262 }
  0xeb   :  { %532 = vperm.xlu1 %1124, %v1261_v7  }
  0xec   :  { %v1265_v10 = vpop.eup %1264 }
  0xef   :  { %522 = vperm.xlu1 %1124, %v1263_v8   ;;  %v378_v8 = vld [vmem:[%s1945_s1 + $0x50] sm:$0xff] }
  0xf0   :  { %v1267_v11 = vpop.eup %1266 }
  0xf3   :  { %512 = vperm.xlu1 %1124, %v1265_v10  }
  0xf7   :  { %502 = vperm.xlu1 %1124, %v1267_v11  }
 0x132   :  { %v493_v16 = vpop.permute.xlu0 %492 }
 0x133   :  { %v578_v20 = vmul.f32 %v493_v16, %v396_v14  ;;  %v579_v21 = vmul.f32 %v493_v16, %v397_v15  ;;  %v377_v14 = vld [vmem:[%s1945_s1 + $0x48] sm:$0xff] }
 0x136   :  { %v498_v19 = vpop.permute.xlu1 %497 }
 0x137   :  { %v580_v22 = vmul.f32 %v498_v19, %v398_v17  ;;  %v581_v23 = vmul.f32 %v498_v19, %v399_v18 }
 0x139   :  { %v617_v9 = vpack.c.bf16 %v581_v23, %v579_v21  ;;  %v616_v24 = vpack.c.bf16 %v580_v22, %v578_v20  ;;  %v374_v20 = vld [vmem:[%s1945_s1 + $0x30] sm:$0xff] }
 0x13a   :  { %v483_v25 = vpop.permute.xlu1 %482 }
 0x13b   :  { %811 = vmatprep.subr.bf16.mxu0 %v617_v9  ;;  %1096 = vmatprep.subr.bf16.mxu1 %v617_v9  ;;  %v574_v31 = vmul.f32 %v483_v25, %v392_v26  ;;  %v575_v32 = vmul.f32 %v483_v25, %v393_v27  ;;  %v375_v9 = vld [vmem:[%s1945_s1 + $0x38] sm:$0xff]  ;;  %v373_v25 = vld [vmem:[%s1945_s1 + $0x28] sm:$0xff] }
 0x13c   :  { %812 = vmatpush1.bf16.msra.mxu0 %v616_v24  ;;  %1109 = vmatpush1.bf16.msra.mxu1 %v616_v24  ;;  %v372_v24 = vld [vmem:[%s1945_s1 + $0x20] sm:$0xff] }
 0x13e   :  { %v488_v30 = vpop.permute.xlu1 %487 }
 0x13f   :  { %v576_v33 = vmul.f32 %v488_v30, %v394_v28  ;;  %v577_v34 = vmul.f32 %v488_v30, %v395_v29 }
 0x141   :  { %v614_v35 = vpack.c.bf16 %v576_v33, %v574_v31  ;;  %v615_v36 = vpack.c.bf16 %v577_v34, %v575_v32  ;;  %v370_v31 = vld [vmem:[%s1945_s1 + $0x10] sm:$0xff]  ;;  %v371_v34 = vld [vmem:[%s1945_s1 + $0x18] sm:$0xff] }
 0x142   :  { %v473_v37 = vpop.permute.xlu1 %472 }
 0x143   :  { %813 = vmatprep.subr.bf16.mxu0 %v615_v36  ;;  %1097 = vmatprep.subr.bf16.mxu1 %v615_v36  ;;  %v570_v44 = vmul.f32 %v473_v37, %v388_v38  ;;  %v571_v45 = vmul.f32 %v473_v37, %v389_v39  ;;  %v369_v36 = vld [vmem:[%s1945_s1 + $0x8] sm:$0xff] }
 0x144   :  { %v458_v40 = vpop.permute.xlu0 %457  ;;  %814 = vmatpush1.bf16.msra.mxu0 %v614_v35  ;;  %1110 = vmatpush1.bf16.msra.mxu1 %v614_v35  ;;  %v368_v35 = vld [vmem:[%s1945_s1] sm:$0xff] }
 0x145   :  { %v564_v5 = vmul.f32 %v458_v40, %v382_v58  ;;  %v565_v7 = vmul.f32 %v458_v40, %v383_v63  ;;  %v415_v58 = vld [vmem:[%s1945_s1 + $0x178] sm:$0xff] }
 0x146   :  { %v478_v43 = vpop.permute.xlu1 %477 }
 0x147   :  { %v572_v46 = vmul.f32 %v478_v43, %v390_v41  ;;  %v573_v47 = vmul.f32 %v478_v43, %v391_v42  ;;  %v418_v43 = vld [vmem:[%s1945_s1 + $0x190] sm:$0xff] }
 0x148   :  { %v448_v48 = vpop.permute.xlu0 %447 }
 0x149   :  { %v612_v49 = vpack.c.bf16 %v572_v46, %v570_v44  ;;  %v613_v50 = vpack.c.bf16 %v573_v47, %v571_v45  ;;  %v560_v17 = vmul.f32 %v448_v48, %v378_v8  ;;  %v561_v19 = vmul.f32 %v448_v48, %v379_v12  ;;  %v419_v46 = vld [vmem:[%s1945_s1 + $0x198] sm:$0xff]  ;;  %v416_v47 = vld [vmem:[%s1945_s1 + $0x180] sm:$0xff]  ;;  %v417_v48 = vld [vmem:[%s1945_s1 + $0x188] sm:$0xff] }
 0x14a   :  { %v463_v51 = vpop.permute.xlu1 %462 }
 0x14b   :  { %815 = vmatprep.subr.bf16.mxu0 %v613_v50  ;;  %1098 = vmatprep.subr.bf16.mxu1 %v613_v50  ;;  %v566_v59 = vmul.f32 %v463_v51, %v384_v52  ;;  %v567_v60 = vmul.f32 %v463_v51, %v385_v53 }
 0x14c   :  { %v438_v54 = vpop.permute.xlu0 %437  ;;  %816 = vmatpush1.bf16.msra.mxu0 %v612_v49  ;;  %1111 = vmatpush1.bf16.msra.mxu1 %v612_v49 }
 0x14d   :  { %v556_v28 = vmul.f32 %v438_v54, %v374_v20  ;;  %v557_v30 = vmul.f32 %v438_v54, %v375_v9  ;;  %v414_v54 = vld [vmem:[%s1945_s1 + $0x170] sm:$0xff]  ;;  %v405_v20 = vld [vmem:[%s1945_s1 + $0x128] sm:$0xff] }
 0x14e   :  { %v468_v57 = vpop.permute.xlu1 %467 }
 0x14f   :  { %v568_v61 = vmul.f32 %v468_v57, %v386_v55  ;;  %v569_v62 = vmul.f32 %v468_v57, %v387_v56 }
 0x150   :  { %v428_v4 = vpop.permute.xlu0 %427 }
 0x151   :  { %v610_v2 = vpack.c.bf16 %v568_v61, %v566_v59  ;;  %v611_v3 = vpack.c.bf16 %v569_v62, %v567_v60  ;;  %v552_v40 = vmul.f32 %v428_v4, %v370_v31  ;;  %v553_v42 = vmul.f32 %v428_v4, %v371_v34  ;;  %v412_v59 = vld [vmem:[%s1945_s1 + $0x160] sm:$0xff]  ;;  %v413_v60 = vld [vmem:[%s1945_s1 + $0x168] sm:$0xff] }
 0x152   :  { %v453_v6 = vpop.permute.xlu1 %452  ;;  %v401_v31 = vld [vmem:[%s1945_s1 + $0x108] sm:$0xff] }
 0x153   :  { %v562_v10 = vmul.f32 %v453_v6, %v380_v0  ;;  %v563_v11 = vmul.f32 %v453_v6, %v381_v1  ;;  %817 = vmatprep.subr.bf16.mxu0 %v611_v3  ;;  %1099 = vmatprep.subr.bf16.mxu1 %v611_v3  ;;  %v408_v6 = vld [vmem:[%s1945_s1 + $0x140] sm:$0xff] }
 0x154   :  { %818 = vmatpush1.bf16.msra.mxu0 %v610_v2  ;;  %1112 = vmatpush1.bf16.msra.mxu1 %v610_v2  ;;  %v548_v21 = vpop.permute.xlu0 %547  ;;  %v410_v2 = vld [vmem:[%s1945_s1 + $0x150] sm:$0xff] }
 0x155   :  { %v608_v15 = vpack.c.bf16 %v564_v5, %v562_v10  ;;  %v609_v16 = vpack.c.bf16 %v565_v7, %v563_v11  ;;  %v600_v51 = vmul.f32 %v548_v21, %v418_v43  ;;  %v601_v53 = vmul.f32 %v548_v21, %v419_v46  ;;  %v411_v5 = vld [vmem:[%s1945_s1 + $0x158] sm:$0xff]  ;;  %v409_v7 = vld [vmem:[%s1945_s1 + $0x148] sm:$0xff] }
 0x156   :  { %v443_v18 = vpop.permute.xlu1 %442  ;;  %v1131_v43 = vld [vmem:[%s1944_s4 + $0x14] ss:$8 sps:$4 sm:$0xff]   ;;  %v1136_v46 = vld [vmem:[%s1944_s4 + $0x80] ss:$8 sps:$4 sm:$0xff]  }
 0x157   :  { %v558_v22 = vmul.f32 %v443_v18, %v376_v13  ;;  %v559_v23 = vmul.f32 %v443_v18, %v377_v14  ;;  %819 = vmatprep.subr.bf16.mxu0 %v609_v16  ;;  %1100 = vmatprep.subr.bf16.mxu1 %v609_v16  ;;  %v407_v18 = vld [vmem:[%s1945_s1 + $0x138] sm:$0xff] }
 0x158   :  { %820 = vmatpush1.bf16.msra.mxu0 %v608_v15  ;;  %1113 = vmatpush1.bf16.msra.mxu1 %v608_v15  ;;  %v538_v37 = vpop.permute.xlu0 %537  ;;  %v406_v15 = vld [vmem:[%s1945_s1 + $0x130] sm:$0xff] }
 0x159   :  { %v606_v26 = vpack.c.bf16 %v560_v17, %v558_v22  ;;  %v607_v27 = vpack.c.bf16 %v561_v19, %v559_v23  ;;  %v596_v63 = vmul.f32 %v538_v37, %v414_v54  ;;  %v597_v1 = vmul.f32 %v538_v37, %v415_v58  ;;  %v404_v19 = vld [vmem:[%s1945_s1 + $0x120] sm:$0xff]  ;;  %v1154_v58 = vld [vmem:[%s1944_s4 + $0xb0] ss:$8 sps:$4 sm:$0xff]  }
 0x15a   :  { %v433_v29 = vpop.permute.xlu1 %432  ;;  %v1148_v54 = vld [vmem:[%s1944_s4 + $0xa0] ss:$8 sps:$4 sm:$0xff]  }
 0x15b   :  { %v554_v32 = vmul.f32 %v433_v29, %v372_v24  ;;  %v555_v33 = vmul.f32 %v433_v29, %v373_v25  ;;  %821 = vmatprep.subr.bf16.mxu0 %v607_v27  ;;  %1101 = vmatprep.subr.bf16.mxu1 %v607_v27  ;;  %v402_v25 = vld [vmem:[%s1945_s1 + $0x110] sm:$0xff]  ;;  %v403_v29 = vld [vmem:[%s1945_s1 + $0x118] sm:$0xff] }
 0x15c   :  { %822 = vmatpush1.bf16.msra.mxu0 %v606_v26  ;;  %1114 = vmatpush1.bf16.msra.mxu1 %v606_v26  ;;  %v528_v55 = vpop.permute.xlu0 %527 }
 0x15d   :  { %v604_v38 = vpack.c.bf16 %v556_v28, %v554_v32  ;;  %v605_v39 = vpack.c.bf16 %v557_v30, %v555_v33  ;;  %v592_v12 = vmul.f32 %v528_v55, %v410_v2  ;;  %v593_v14 = vmul.f32 %v528_v55, %v411_v5  ;;  %v400_v30 = vld [vmem:[%s1945_s1 + $0x100] sm:$0xff] }
 0x15e   :  { %v423_v41 = vpop.permute.xlu1 %422  ;;  %v1149_v55 = vld [vmem:[%s1944_s4 + $0x44] ss:$8 sps:$4 sm:$0xff]  }
 0x15f   :  { %v550_v44 = vmul.f32 %v423_v41, %v368_v35  ;;  %v551_v45 = vmul.f32 %v423_v41, %v369_v36  ;;  %823 = vmatprep.subr.bf16.mxu0 %v605_v39  ;;  %1102 = vmatprep.subr.bf16.mxu1 %v605_v39  ;;  %v1125_v41 = vld [vmem:[%s1944_s4] ss:$8 sps:$4 sm:$0xff]  }
 0x160   :  { %824 = vmatpush1.bf16.msra.mxu0 %v604_v38  ;;  %1115 = vmatpush1.bf16.msra.mxu1 %v604_v38  ;;  %v518_v8 = vpop.permute.xlu0 %517 }
 0x161   :  { %v602_v49 = vpack.c.bf16 %v552_v40, %v550_v44  ;;  %v603_v50 = vpack.c.bf16 %v553_v42, %v551_v45  ;;  %v588_v23 = vmul.f32 %v518_v8, %v406_v15  ;;  %v589_v24 = vmul.f32 %v518_v8, %v407_v18  ;;  %v1128_v42 = vld [vmem:[%s1944_s4 + $0x70] ss:$8 sps:$4 sm:$0xff]   ;;  %v1134_v44 = vld [vmem:[%s1944_s4 + $0x84] ss:$8 sps:$4 sm:$0xff]  }
 0x162   :  { %v543_v52 = vpop.permute.xlu1 %542  ;;  %v1133_v45 = vld [vmem:[%s1944_s4 + $0x10] ss:$8 sps:$4 sm:$0xff]  }
 0x163   :  { %v598_v56 = vmul.f32 %v543_v52, %v416_v47  ;;  %v599_v57 = vmul.f32 %v543_v52, %v417_v48  ;;  %825 = vmatprep.subr.bf16.mxu0 %v603_v50  ;;  %1103 = vmatprep.subr.bf16.mxu1 %v603_v50  ;;  %v1137_v47 = vld [vmem:[%s1944_s4 + $0x24] ss:$8 sps:$4 sm:$0xff]   ;;  %v1140_v48 = vld [vmem:[%s1944_s4 + $0x94] ss:$8 sps:$4 sm:$0xff]   ;;  %v1142_v50 = vld [vmem:[%s1944_s4 + $0x90] ss:$8 sps:$4 sm:$0xff]  }
 0x164   :  { %826 = vmatpush1.bf16.msra.mxu0 %v602_v49  ;;  %1116 = vmatpush1.bf16.msra.mxu1 %v602_v49  ;;  %v508_v26 = vpop.permute.xlu0 %507  ;;  %v1139_v49 = vld [vmem:[%s1944_s4 + $0x20] ss:$8 sps:$4 sm:$0xff]   ;;  %v1146_v52 = vld [vmem:[%s1944_s4 + $0xa4] ss:$8 sps:$4 sm:$0xff]  }
 0x165   :  { %v626_v61 = vpack.c.bf16 %v600_v51, %v598_v56  ;;  %v627_v62 = vpack.c.bf16 %v601_v53, %v599_v57  ;;  %v584_v34 = vmul.f32 %v508_v26, %v402_v25  ;;  %v585_v36 = vmul.f32 %v508_v26, %v403_v29  ;;  %v1143_v51 = vld [vmem:[%s1944_s4 + $0x34] ss:$8 sps:$4 sm:$0xff]   ;;  %v1145_v53 = vld [vmem:[%s1944_s4 + $0x30] ss:$8 sps:$4 sm:$0xff]   ;;  %v1151_v57 = vld [vmem:[%s1944_s4 + $0x40] ss:$8 sps:$4 sm:$0xff]  }
 0x166   :  { %v533_v0 = vpop.permute.xlu1 %532  ;;  %v1152_v56 = vld [vmem:[%s1944_s4 + $0xb4] ss:$8 sps:$4 sm:$0xff]  }
 0x167   :  { %v594_v3 = vmul.f32 %v533_v0, %v412_v59  ;;  %v595_v4 = vmul.f32 %v533_v0, %v413_v60  ;;  %833 = vmatprep.subr.bf16.mxu0 %v627_v62  ;;  %1104 = vmatprep.subr.bf16.mxu1 %v627_v62  ;;  %v1155_v59 = vld [vmem:[%s1944_s4 + $0x54] ss:$8 sps:$4 sm:$0xff]   ;;  %v1158_v60 = vld [vmem:[%s1944_s4 + $0xc4] ss:$8 sps:$4 sm:$0xff]   ;;  %v1160_v62 = vld [vmem:[%s1944_s4 + $0xc0] ss:$8 sps:$4 sm:$0xff]  }
 0x168   :  { %834 = vmatpush2.bf16.msra.mxu0 %v626_v61  ;;  %1117 = vmatpush2.bf16.msra.mxu1 %v626_v61  ;;  %v1157_v61 = vld [vmem:[%s1944_s4 + $0x50] ss:$8 sps:$4 sm:$0xff]   ;;  %v1163_v0 = vld [vmem:[%s1944_s4 + $0x60] ss:$8 sps:$4 sm:$0xff]  }
 0x169   :  { %v624_v10 = vpack.c.bf16 %v596_v63, %v594_v3  ;;  %v625_v11 = vpack.c.bf16 %v597_v1, %v595_v4  ;;  %v1161_v63 = vld [vmem:[%s1944_s4 + $0x64] ss:$8 sps:$4 sm:$0xff]  }
 0x16a   :  { %v523_v13 = vpop.permute.xlu1 %522 }
 0x16b   :  { %v590_v16 = vmul.f32 %v523_v13, %v408_v6  ;;  %v591_v17 = vmul.f32 %v523_v13, %v409_v7  ;;  %835 = vmatprep.subr.bf16.mxu0 %v625_v11  ;;  %1105 = vmatprep.subr.bf16.mxu1 %v625_v11 }
 0x16c   :  { %836 = vmatpush2.bf16.msra.mxu0 %v624_v10  ;;  %1118 = vmatpush2.bf16.msra.mxu1 %v624_v10 }
 0x16d   :  { %v622_v21 = vpack.c.bf16 %v592_v12, %v590_v16  ;;  %v623_v22 = vpack.c.bf16 %v593_v14, %v591_v17 }
 0x16e   :  { %v513_v9 = vpop.permute.xlu1 %512 }
 0x16f   :  { %v586_v27 = vmul.f32 %v513_v9, %v404_v19  ;;  %v587_v28 = vmul.f32 %v513_v9, %v405_v20  ;;  %837 = vmatprep.subr.bf16.mxu0 %v623_v22  ;;  %1106 = vmatprep.subr.bf16.mxu1 %v623_v22 }
 0x170   :  { %838 = vmatpush2.bf16.msra.mxu0 %v622_v21  ;;  %1119 = vmatpush2.bf16.msra.mxu1 %v622_v21 }
 0x171   :  { %v620_v32 = vpack.c.bf16 %v588_v23, %v586_v27  ;;  %v621_v33 = vpack.c.bf16 %v589_v24, %v587_v28 }
 0x172   :  { %v503_v35 = vpop.permute.xlu1 %502 }
 0x173   :  { %v582_v37 = vmul.f32 %v503_v35, %v400_v30  ;;  %v583_v38 = vmul.f32 %v503_v35, %v401_v31  ;;  %839 = vmatprep.subr.bf16.mxu0 %v621_v33  ;;  %1107 = vmatprep.subr.bf16.mxu1 %v621_v33 }
 0x174   :  { %840 = vmatpush2.bf16.msra.mxu0 %v620_v32  ;;  %1120 = vmatpush2.bf16.msra.mxu1 %v620_v32 }
 0x175   :  { %v618_v39 = vpack.c.bf16 %v584_v34, %v582_v37  ;;  %v619_v40 = vpack.c.bf16 %v585_v36, %v583_v38 }
 0x177   :  { %841 = vmatprep.subr.bf16.mxu0 %v619_v40  ;;  %1108 = vmatprep.subr.bf16.mxu1 %v619_v40 }
 0x178   :  { %842 = vmatpush2.bf16.msra.mxu0 %v618_v39  ;;  %1121 = vmatpush2.bf16.msra.mxu1 %v618_v39 }
 0x17b   :  { %844 = vmatmul.mubr.bf16.vlgmr.msra.gmra.mxu0 %v1125_v41  ;;  %914 = vmatmul.mubr.bf16.vlgmr.msra.gmra.mxu1 %v1128_v42 }
 0x17c   :  { %1084 = vmatprep.mubr.msk.bf16.mxu0 %vm771_vm1, %v1131_v43  ;;  %1091 = vmatprep.mubr.msk.bf16.mxu1 %vm771_vm1, %v1134_v44 }
 0x183   :  { %854 = vmatmul.mubr.bf16.gmra.mxu0 %v1133_v45  ;;  %924 = vmatmul.mubr.bf16.gmra.mxu1 %v1136_v46 }
 0x184   :  { %1085 = vmatprep.mubr.msk.bf16.mxu0 %vm771_vm1, %v1137_v47  ;;  %1092 = vmatprep.mubr.msk.bf16.mxu1 %vm771_vm1, %v1140_v48 }
 0x18b   :  { %864 = vmatmul.mubr.bf16.gmra.mxu0 %v1139_v49  ;;  %934 = vmatmul.mubr.bf16.gmra.mxu1 %v1142_v50 }
 0x18c   :  { %1086 = vmatprep.mubr.msk.bf16.mxu0 %vm771_vm1, %v1143_v51  ;;  %1093 = vmatprep.mubr.msk.bf16.mxu1 %vm771_vm1, %v1146_v52 }
 0x193   :  { %874 = vmatmul.mubr.bf16.gmra.mxu0 %v1145_v53  ;;  %944 = vmatmul.mubr.bf16.gmra.mxu1 %v1148_v54 }
 0x194   :  { %1087 = vmatprep.mubr.msk.bf16.mxu0 %vm771_vm1, %v1149_v55  ;;  %1094 = vmatprep.mubr.msk.bf16.mxu1 %vm771_vm1, %v1152_v56 }
 0x19b   :  { %884 = vmatmul.mubr.bf16.gmra.mxu0 %v1151_v57  ;;  %954 = vmatmul.mubr.bf16.gmra.mxu1 %v1154_v58 }
 0x19c   :  { %1088 = vmatprep.mubr.msk.bf16.mxu0 %vm771_vm1, %v1155_v59  ;;  %1095 = vmatprep.mubr.msk.bf16.mxu1 %vm771_vm1, %v1158_v60 }
 0x1a3   :  { %894 = vmatmul.mubr.bf16.gmra.mxu0 %v1157_v61  ;;  %964 = vmatmul.mubr.bf16.gmra.mxu1 %v1160_v62 }
 0x1a4   :  { %1089 = vmatprep.mubr.msk.bf16.mxu0 %vm771_vm1, %v1161_v63 }
 0x1ab   :  { %904 = vmatmul.mubr.bf16.gmra.mxu0 %v1163_v0 }
 0x23b   :  { %v845_v1 = vpop.f32.mrf.mxu0  ;;  %v915_v2 = vpop.f32.mrf.mxu1 }
 0x23c   :  { %974 = vst [vmem:[%s1946_s5] sm:$0xff] %v845_v1  ;;  %1003 = vst [vmem:[%s1946_s5 + $0xe0] sm:$0xff] %v915_v2 }
 0x23d   :  { %v847_v3 = vpop.f32.mrf.mxu0  ;;  %v917_v4 = vpop.f32.mrf.mxu1 }
 0x23e   :  { %976 = vst.msk [vmem:[%s1946_s5 + $0x8] sm:$0xff] %vm975_vm2, %v847_v3  ;;  %1004 = vst.msk [vmem:[%s1946_s5 + $0xe8] sm:$0xff] %vm975_vm2, %v917_v4 }
 0x23f   :  { %v849_v5 = vpop.f32.mrf.mxu0  ;;  %v919_v6 = vpop.f32.mrf.mxu1 }
 0x240   :  { %977 = vst [vmem:[%s1946_s5 + $0x10] sm:$0xff] %v849_v5  ;;  %1005 = vst [vmem:[%s1946_s5 + $0xf0] sm:$0xff] %v919_v6 }
 0x241   :  { %v851_v7 = vpop.f32.mrf.mxu0  ;;  %v921_v8 = vpop.f32.mrf.mxu1 }
 0x242   :  { %978 = vst.msk [vmem:[%s1946_s5 + $0x18] sm:$0xff] %vm975_vm2, %v851_v7  ;;  %1006 = vst.msk [vmem:[%s1946_s5 + $0xf8] sm:$0xff] %vm975_vm2, %v921_v8 }
 0x243   :  { %v855_v10 = vpop.f32.mrf.mxu0  ;;  %v925_v11 = vpop.f32.mrf.mxu1 }
 0x244   :  { %979 = vst [vmem:[%s1946_s5 + $0x20] sm:$0xff] %v855_v10  ;;  %1007 = vst [vmem:[%s1946_s5 + $0x100] sm:$0xff] %v925_v11 }
 0x245   :  { %v857_v12 = vpop.f32.mrf.mxu0  ;;  %v927_v13 = vpop.f32.mrf.mxu1 }
 0x246   :  { %980 = vst.msk [vmem:[%s1946_s5 + $0x28] sm:$0xff] %vm975_vm2, %v857_v12  ;;  %1008 = vst.msk [vmem:[%s1946_s5 + $0x108] sm:$0xff] %vm975_vm2, %v927_v13 }
 0x247   :  { %v859_v14 = vpop.f32.mrf.mxu0  ;;  %v929_v15 = vpop.f32.mrf.mxu1 }
 0x248   :  { %981 = vst [vmem:[%s1946_s5 + $0x30] sm:$0xff] %v859_v14  ;;  %1009 = vst [vmem:[%s1946_s5 + $0x110] sm:$0xff] %v929_v15 }
 0x249   :  { %v861_v16 = vpop.f32.mrf.mxu0  ;;  %v931_v17 = vpop.f32.mrf.mxu1 }
 0x24a   :  { %982 = vst.msk [vmem:[%s1946_s5 + $0x38] sm:$0xff] %vm975_vm2, %v861_v16  ;;  %1010 = vst.msk [vmem:[%s1946_s5 + $0x118] sm:$0xff] %vm975_vm2, %v931_v17 }
 0x24b   :  { %v865_v18 = vpop.f32.mrf.mxu0  ;;  %v935_v19 = vpop.f32.mrf.mxu1 }
 0x24c   :  { %983 = vst [vmem:[%s1946_s5 + $0x40] sm:$0xff] %v865_v18  ;;  %1011 = vst [vmem:[%s1946_s5 + $0x120] sm:$0xff] %v935_v19 }
 0x24d   :  { %v867_v20 = vpop.f32.mrf.mxu0  ;;  %v937_v21 = vpop.f32.mrf.mxu1 }
 0x24e   :  { %984 = vst.msk [vmem:[%s1946_s5 + $0x48] sm:$0xff] %vm975_vm2, %v867_v20  ;;  %1012 = vst.msk [vmem:[%s1946_s5 + $0x128] sm:$0xff] %vm975_vm2, %v937_v21 }
 0x24f   :  { %v869_v22 = vpop.f32.mrf.mxu0  ;;  %v939_v23 = vpop.f32.mrf.mxu1 }
 0x250   :  { %985 = vst [vmem:[%s1946_s5 + $0x50] sm:$0xff] %v869_v22  ;;  %1013 = vst [vmem:[%s1946_s5 + $0x130] sm:$0xff] %v939_v23 }
 0x251   :  { %v871_v9 = vpop.f32.mrf.mxu0  ;;  %v941_v24 = vpop.f32.mrf.mxu1 }
 0x252   :  { %986 = vst.msk [vmem:[%s1946_s5 + $0x58] sm:$0xff] %vm975_vm2, %v871_v9  ;;  %1014 = vst.msk [vmem:[%s1946_s5 + $0x138] sm:$0xff] %vm975_vm2, %v941_v24 }
 0x253   :  { %v875_v25 = vpop.f32.mrf.mxu0  ;;  %v945_v26 = vpop.f32.mrf.mxu1 }
 0x254   :  { %987 = vst [vmem:[%s1946_s5 + $0x60] sm:$0xff] %v875_v25  ;;  %1015 = vst [vmem:[%s1946_s5 + $0x140] sm:$0xff] %v945_v26 }
 0x255   :  { %v877_v27 = vpop.f32.mrf.mxu0  ;;  %v947_v28 = vpop.f32.mrf.mxu1 }
 0x256   :  { %988 = vst.msk [vmem:[%s1946_s5 + $0x68] sm:$0xff] %vm975_vm2, %v877_v27  ;;  %1016 = vst.msk [vmem:[%s1946_s5 + $0x148] sm:$0xff] %vm975_vm2, %v947_v28 }
 0x257   :  { %v879_v29 = vpop.f32.mrf.mxu0  ;;  %v949_v30 = vpop.f32.mrf.mxu1 }
 0x258   :  { %989 = vst [vmem:[%s1946_s5 + $0x70] sm:$0xff] %v879_v29  ;;  %1017 = vst [vmem:[%s1946_s5 + $0x150] sm:$0xff] %v949_v30 }
 0x259   :  { %v881_v31 = vpop.f32.mrf.mxu0  ;;  %v951_v32 = vpop.f32.mrf.mxu1 }
 0x25a   :  { %990 = vst.msk [vmem:[%s1946_s5 + $0x78] sm:$0xff] %vm975_vm2, %v881_v31  ;;  %1018 = vst.msk [vmem:[%s1946_s5 + $0x158] sm:$0xff] %vm975_vm2, %v951_v32 }
 0x25b   :  { %v885_v33 = vpop.f32.mrf.mxu0  ;;  %v955_v34 = vpop.f32.mrf.mxu1 }
 0x25c   :  { %991 = vst [vmem:[%s1946_s5 + $0x80] sm:$0xff] %v885_v33  ;;  %1019 = vst [vmem:[%s1946_s5 + $0x160] sm:$0xff] %v955_v34 }
 0x25d   :  { %v887_v35 = vpop.f32.mrf.mxu0  ;;  %v957_v36 = vpop.f32.mrf.mxu1 }
 0x25e   :  { %992 = vst.msk [vmem:[%s1946_s5 + $0x88] sm:$0xff] %vm975_vm2, %v887_v35  ;;  %1020 = vst.msk [vmem:[%s1946_s5 + $0x168] sm:$0xff] %vm975_vm2, %v957_v36 }
 0x25f   :  { %v889_v37 = vpop.f32.mrf.mxu0  ;;  %v959_v38 = vpop.f32.mrf.mxu1 }
 0x260   :  { %993 = vst [vmem:[%s1946_s5 + $0x90] sm:$0xff] %v889_v37  ;;  %1021 = vst [vmem:[%s1946_s5 + $0x170] sm:$0xff] %v959_v38 }
 0x261   :  { %v891_v39 = vpop.f32.mrf.mxu0  ;;  %v961_v40 = vpop.f32.mrf.mxu1 }
 0x262   :  { %994 = vst.msk [vmem:[%s1946_s5 + $0x98] sm:$0xff] %vm975_vm2, %v891_v39  ;;  %1022 = vst.msk [vmem:[%s1946_s5 + $0x178] sm:$0xff] %vm975_vm2, %v961_v40 }
 0x263   :  { %v895_v41 = vpop.f32.mrf.mxu0  ;;  %v965_v42 = vpop.f32.mrf.mxu1 }
 0x264   :  { %995 = vst [vmem:[%s1946_s5 + $0xa0] sm:$0xff] %v895_v41  ;;  %1023 = vst [vmem:[%s1946_s5 + $0x180] sm:$0xff] %v965_v42 }
 0x265   :  { %v897_v43 = vpop.f32.mrf.mxu0  ;;  %v967_v44 = vpop.f32.mrf.mxu1 }
 0x266   :  { %996 = vst.msk [vmem:[%s1946_s5 + $0xa8] sm:$0xff] %vm975_vm2, %v897_v43  ;;  %1024 = vst.msk [vmem:[%s1946_s5 + $0x188] sm:$0xff] %vm975_vm2, %v967_v44 }
 0x267   :  { %v899_v45 = vpop.f32.mrf.mxu0  ;;  %v969_v46 = vpop.f32.mrf.mxu1 }
 0x268   :  { %997 = vst [vmem:[%s1946_s5 + $0xb0] sm:$0xff] %v899_v45  ;;  %1025 = vst [vmem:[%s1946_s5 + $0x190] sm:$0xff] %v969_v46 }
 0x269   :  { %v901_v47 = vpop.f32.mrf.mxu0  ;;  %v971_v48 = vpop.f32.mrf.mxu1 }
 0x26a   :  { %998 = vst.msk [vmem:[%s1946_s5 + $0xb8] sm:$0xff] %vm975_vm2, %v901_v47  ;;  %1026 = vst.msk [vmem:[%s1946_s5 + $0x198] sm:$0xff] %vm975_vm2, %v971_v48 }
 0x26b   :  { %v905_v49 = vpop.f32.mrf.mxu0 }
 0x26c   :  { %999 = vst [vmem:[%s1946_s5 + $0xc0] sm:$0xff] %v905_v49 }
 0x26d   :  { %v907_v50 = vpop.f32.mrf.mxu0 }
 0x26e   :  { %1000 = vst.msk [vmem:[%s1946_s5 + $0xc8] sm:$0xff] %vm975_vm2, %v907_v50 }
 0x26f   :  { %v909_v51 = vpop.f32.mrf.mxu0 }
 0x270   :  { %1001 = vst [vmem:[%s1946_s5 + $0xd0] sm:$0xff] %v909_v51 }
 0x271   :  { %v911_v52 = vpop.f32.mrf.mxu0 }
 0x272   :  { %1002 = vst.msk [vmem:[%s1946_s5 + $0xd8] sm:$0xff] %vm975_vm2, %v911_v52 }

</bundles_post_ra>
